<compile_context>
chip_gen: v5e
topology: v5e:2x2
jax: 0.10.0
libtpu: 0.0.40
codegen_flags: <defaults>
</compile_context>

<pallas_src>
import functools

import jax
import jax.numpy as jnp
from jax.experimental import pallas as pl
from jax.experimental.pallas import tpu as pltpu


def _biaffine_kernel(x1_ref, x2_ref, w2_ref, seg_ref, b_ref, out_ref, *, tile_o):
    """One (batch-tile, output-tile): y = bias + seg_reduce((x1 @ W2) * tile(x2))."""
    x1 = x1_ref[...]                              # (TN, D)   compute dtype
    x2 = x2_ref[...].astype(jnp.float32)          # (TN, D)   no-op cast for f32 inputs

    # (1) Single lane-dense MXU matmul (replaces tile_o tiny (D, D) matmuls):
    #     z[n, o*D + j] = sum_i x1[n, i] * W[o_base + o, i, j]
    z = jnp.dot(x1, w2_ref[...], preferred_element_type=jnp.float32)      # (TN, TO*D)

    # (2) Segmented contraction with x2, expressed as a second MXU matmul
    #     (kept in-kernel so x2 HBM traffic is not multiplied by O):
    #     y[n, o] = sum_j z[n, o*D + j] * x2[n, j]
    x2_rep = jnp.tile(x2, (1, tile_o))                                    # (TN, TO*D)
    y = jnp.dot(z * x2_rep, seg_ref[...], preferred_element_type=jnp.float32)  # (TN, TO)

    out_ref[...] = (y + b_ref[...]).astype(out_ref.dtype)


def _vmem_cap_bytes():
    """Chip-aware VMEM budget with headroom for compiler scratch.

    v5e/v6e: 128 MiB physical -> up to ~96 MiB.   v7x: 64 MiB -> ~48 MiB.
    Falls back to the conservative 48 MiB (valid on every generation).
    """
    try:
        phys = pltpu.get_tpu_info().vmem_capacity_bytes
    except Exception:
        phys = 64 * 1024 * 1024
    return max(32 * 1024 * 1024, int(phys * 0.75))


def biaffine(x1, x2, w, b, *, tile_n=None, tile_o=None, compute_dtype=None):
    """Pallas-backed nn.Bilinear forward.

    x1: (N, D), x2: (N, D), w: (O, D, D), b: (O,) -> (N, O)
    compute_dtype: cast x1/W2 (e.g. jnp.bfloat16) for the MXU; accumulation stays f32.
    """
    N, D = x1.shape
    O = w.shape[0]
    assert w.shape == (O, D, D) and x2.shape == (N, D) and b.shape == (O,)
    out_dtype = x1.dtype

    x_itemsize = jnp.dtype(x1.dtype).itemsize
    w_itemsize = jnp.dtype(compute_dtype if compute_dtype is not None else w.dtype).itemsize
    out_itemsize = jnp.dtype(out_dtype).itemsize

    cap = _vmem_cap_bytes()

    # ---- output tiling (tile_o) -------------------------------------------
    def const_bytes(t_o):
        # Single-buffered resident blocks: W2 slab + SEG + bias.
        return D * t_o * D * w_itemsize + t_o * D * t_o * 4 + t_o * 4

    if tile_o is None:
        tile_o = O
        if O > 128 and const_bytes(O) > int(0.6 * cap):
            tile_o = 128          # lane-axis sub-tiles must be multiples of 128
    # TODO(synk): if const_bytes(tile_o) still exceeds the budget at very large D,
    # add a D ("arbitrary") reduction grid axis with an f32 VMEM accumulator.
    o_pad = (-O) % tile_o
    o_total = O + o_pad
    o_steps = o_total // tile_o

    # ---- batch tiling (tile_n) --------------------------------------------
    if tile_n is None:
        per_row = (2 * 2 * D * x_itemsize          # x1 + x2 tiles, double-buffered
                   + 2 * tile_o * out_itemsize     # out tile, double-buffered
                   + 2 * tile_o * D * 4)           # in-kernel intermediates z, x2_rep (f32)
        budget = cap - const_bytes(tile_o) - (4 << 20)   # 4 MiB slack
        tile_n = max(8, min(2048, budget // max(per_row, 1)))
        tile_n = max(8, (tile_n // 8) * 8)
        tile_n = min(tile_n, max(8, ((N + 7) // 8) * 8))
        # Guarantee >= 2 "parallel" grid steps so both v7x TensorCores get work
        # whenever the batch alone would give a single-step grid.
        if o_steps == 1 and N <= tile_n and N > tile_n // 2 >= 8:
            tile_n = ((tile_n // 2 + 7) // 8) * 8
    tile_n = max(8, ((tile_n + 7) // 8) * 8)

    n_pad = (-N) % tile_n
    n_total = N + n_pad
    n_steps = n_total // tile_n

    # ---- operand preparation (all layout work done once, outside the kernel) ----
    # Lane-dense weight: W2[i, o*D + j] = W[o, i, j]  -> (D, O_pad*D).
    w2 = jnp.transpose(w, (1, 0, 2)).reshape(D, O * D)
    if o_pad:
        w2 = jnp.pad(w2, ((0, 0), (0, o_pad * D)))
    # Block-diagonal segment-sum block, identical for every output tile:
    # SEG[k, o] = 1.0 if k // D == o, shape (tile_o*D, tile_o).
    seg = (jnp.arange(tile_o * D)[:, None] // D
           == jnp.arange(tile_o)[None, :]).astype(jnp.float32)
    # Bias pre-cast once (no per-step astype in the kernel).
    b2 = b.astype(jnp.float32).reshape(1, O)
    if o_pad:
        b2 = jnp.pad(b2, ((0, 0), (0, o_pad)))

    if compute_dtype is not None:
        x1 = x1.astype(compute_dtype)
        w2 = w2.astype(compute_dtype)

    if n_pad:
        x1 = jnp.pad(x1, ((0, n_pad), (0, 0)))
        x2 = jnp.pad(x2, ((0, n_pad), (0, 0)))

    grid = (n_steps, o_steps)
    w_is_constant = (o_steps == 1)   # only single-buffer W2/bias if their index is constant

    def make_in_specs(single_buffer_constants):
        def spec(shape, imap, constant):
            if single_buffer_constants and constant:
                return pl.BlockSpec(shape, imap, pipeline_mode=pl.Buffered(1))
            return pl.BlockSpec(shape, imap)
        return [
            pl.BlockSpec((tile_n, D), lambda i, j: (i, 0)),             # x1 batch tile
            pl.BlockSpec((tile_n, D), lambda i, j: (i, 0)),             # x2 batch tile
            spec((D, tile_o * D), lambda i, j: (0, j), w_is_constant),  # lane-dense weight
            spec((tile_o * D, tile_o), lambda i, j: (0, 0), True),      # segment-sum block
            spec((1, tile_o), lambda i, j: (0, j), w_is_constant),      # bias
        ]

    kernel = functools.partial(_biaffine_kernel, tile_o=tile_o)

    def run(single_buffer_constants):
        return pl.pallas_call(
            kernel,
            out_shape=jax.ShapeDtypeStruct((n_total, o_total), out_dtype),
            grid_spec=pltpu.PrefetchScalarGridSpec(
                num_scalar_prefetch=0,
                grid=grid,
                in_specs=make_in_specs(single_buffer_constants),
                out_specs=pl.BlockSpec((tile_n, tile_o), lambda i, j: (i, j)),
            ),
            compiler_params=pltpu.CompilerParams(
                dimension_semantics=("parallel", "parallel"),
                vmem_limit_bytes=cap,
            ),
        )(x1, x2, w2, seg, b2)

    try:
        out = run(True)
    except Exception:
        # Fallback if this Pallas version rejects Buffered(1); semantics identical.
        out = run(False)

    if n_pad or o_pad:
        out = out[:N, :O]
    return out


if __name__ == "__main__":
    # Module config (synthetic, deterministic): hidden_dim=16 -> input_dim=32,
    # bilinear_dim=8, batch=64.
    hidden_dim = 16
    input_dim = hidden_dim * 2          # 32
    output_dim = 8                      # bilinear_dim
    N = 64                              # batch

    key = jax.random.PRNGKey(0)
    k_w, k_b, k_x1, k_x2 = jax.random.split(key, 4)

    # Deterministic init mimicking nn.Bilinear's uniform(-1/sqrt(in1), 1/sqrt(in1)).
    bound = 1.0 / jnp.sqrt(jnp.float32(input_dim))
    w = jax.random.uniform(k_w, (output_dim, input_dim, input_dim),
                           minval=-bound, maxval=bound, dtype=jnp.float32)
    b = jax.random.uniform(k_b, (output_dim,),
                           minval=-bound, maxval=bound, dtype=jnp.float32)

    inputs = jax.random.normal(k_x1, (N, input_dim), dtype=jnp.float32)
    forward_input = jax.random.normal(k_x2, (N, input_dim), dtype=jnp.float32)

    out = biaffine(inputs, forward_input, w, b)
    out = jax.block_until_ready(out)

    # Pure-JAX reference of torch.nn.Bilinear forward.
    ref = jnp.einsum("ni,oij,nj->no", inputs, w, forward_input) + b
    assert out.shape == (N, output_dim)
    assert jnp.allclose(out, ref, atol=1e-4, rtol=1e-4), "mismatch vs reference"

    print("KERNEL_OK")
</pallas_src>

<mosaic_0001>
module attributes {stable_mosaic.version = 11 : i64} {
  func.func @_biaffine_kernel(%arg0: i32, %arg1: i32, %arg2: memref<32x32xf32, #tpu.memory_space<vmem>>, %arg3: memref<32x32xf32, #tpu.memory_space<vmem>>, %arg4: memref<32x256xf32, #tpu.memory_space<vmem>>, %arg5: memref<256x8xf32, #tpu.memory_space<vmem>>, %arg6: memref<1x8xf32, #tpu.memory_space<vmem>>, %arg7: memref<32x8xf32, #tpu.memory_space<vmem>>) attributes {dimension_semantics = [#tpu.dimension_semantics<parallel>, #tpu.dimension_semantics<parallel>], iteration_bounds = array<i64: 2, 1>, scalar_prefetch = 0 : i64, scratch_operands = 0 : i64, tpu.core_type = #tpu.core_type<tc>, window_params = [{transform_indices = @transform_0, window_bounds = array<i64: 32, 32>}, {transform_indices = @transform_1, window_bounds = array<i64: 32, 32>}, {pipeline_mode = #tpu.pipeline_mode<synchronous>, transform_indices = @transform_2, window_bounds = array<i64: 32, 256>}, {pipeline_mode = #tpu.pipeline_mode<synchronous>, transform_indices = @transform_3, window_bounds = array<i64: 256, 8>}, {pipeline_mode = #tpu.pipeline_mode<synchronous>, transform_indices = @transform_4, window_bounds = array<i64: 1, 8>}, {transform_indices = @transform_5, window_bounds = array<i64: 32, 8>}]} {
    %c0 = arith.constant 0 : index
    %c0_0 = arith.constant 0 : index
    %0 = vector.load %arg2[%c0, %c0_0] : memref<32x32xf32, #tpu.memory_space<vmem>>, vector<32x32xf32>
    %c0_1 = arith.constant 0 : index
    %c0_2 = arith.constant 0 : index
    %1 = vector.load %arg3[%c0_1, %c0_2] : memref<32x32xf32, #tpu.memory_space<vmem>>, vector<32x32xf32>
    %c0_3 = arith.constant 0 : index
    %c0_4 = arith.constant 0 : index
    %2 = vector.load %arg4[%c0_3, %c0_4] : memref<32x256xf32, #tpu.memory_space<vmem>>, vector<32x256xf32>
    %cst = arith.constant dense<0.000000e+00> : vector<32x256xf32>
    %3 = tpu.matmul %0, %2, %cst {dimension_numbers = #tpu.dot_dimension_numbers<[1], [0], [0], [1], [0, 0, 1, 1], [], []>} : vector<32x32xf32>, vector<32x256xf32>, vector<32x256xf32> -> vector<32x256xf32>
    %4 = tpu.concatenate %1, %1, %1, %1, %1, %1, %1, %1 in 1 : vector<32x32xf32>, vector<32x32xf32>, vector<32x32xf32>, vector<32x32xf32>, vector<32x32xf32>, vector<32x32xf32>, vector<32x32xf32>, vector<32x32xf32> -> vector<32x256xf32>
    %5 = arith.mulf %3, %4 : vector<32x256xf32>
    %c0_5 = arith.constant 0 : index
    %c0_6 = arith.constant 0 : index
    %6 = vector.load %arg5[%c0_5, %c0_6] : memref<256x8xf32, #tpu.memory_space<vmem>>, vector<256x8xf32>
    %cst_7 = arith.constant dense<0.000000e+00> : vector<32x8xf32>
    %7 = tpu.matmul %5, %6, %cst_7 {dimension_numbers = #tpu.dot_dimension_numbers<[1], [0], [0], [1], [0, 0, 1, 1], [], []>} : vector<32x256xf32>, vector<256x8xf32>, vector<32x8xf32> -> vector<32x8xf32>
    %c0_8 = arith.constant 0 : index
    %c0_9 = arith.constant 0 : index
    %8 = vector.load %arg6[%c0_8, %c0_9] : memref<1x8xf32, #tpu.memory_space<vmem>>, vector<1x8xf32>
    %9 = vector.broadcast %8 : vector<1x8xf32> to vector<32x8xf32>
    %10 = arith.addf %7, %9 : vector<32x8xf32>
    %c0_10 = arith.constant 0 : index
    %c0_11 = arith.constant 0 : index
    %11 = vector.load %arg7[%c0_10, %c0_11] : memref<32x8xf32, #tpu.memory_space<vmem>>, vector<32x8xf32>
    tpu.vector_store %arg7[%c0_10, %c0_11], %10 {strides = array<i32>} : memref<32x8xf32, #tpu.memory_space<vmem>>, vector<32x8xf32>,
    return
  }
  func.func @transform_0(%arg0: i32, %arg1: i32) -> (i32, i32) {
    %c0_i32 = arith.constant 0 : i32
    %c0_i32_0 = arith.constant 0 : i32
    return %arg0, %c0_i32 : i32, i32
  }
  func.func @transform_1(%arg0: i32, %arg1: i32) -> (i32, i32) {
    %c0_i32 = arith.constant 0 : i32
    %c0_i32_0 = arith.constant 0 : i32
    return %arg0, %c0_i32 : i32, i32
  }
  func.func @transform_2(%arg0: i32, %arg1: i32) -> (i32, i32) {
    %c0_i32 = arith.constant 0 : i32
    %c0_i32_0 = arith.constant 0 : i32
    return %c0_i32, %arg1 : i32, i32
  }
  func.func @transform_3(%arg0: i32, %arg1: i32) -> (i32, i32) {
    %c0_i32 = arith.constant 0 : i32
    %c0_i32_0 = arith.constant 0 : i32
    %c0_i32_1 = arith.constant 0 : i32
    return %c0_i32, %c0_i32_0 : i32, i32
  }
  func.func @transform_4(%arg0: i32, %arg1: i32) -> (i32, i32) {
    %c0_i32 = arith.constant 0 : i32
    %c0_i32_0 = arith.constant 0 : i32
    return %c0_i32, %arg1 : i32, i32
  }
  func.func @transform_5(%arg0: i32, %arg1: i32) -> (i32, i32) {
    %c0_i32 = arith.constant 0 : i32
    return %arg0, %arg1 : i32, i32
  }
}

module attributes {stable_mosaic.version = 11 : i64} {
  func.func @_biaffine_kernel(%arg0: i32, %arg1: i32, %arg2: memref<32x32xf32, #tpu.memory_space<vmem>>, %arg3: memref<32x32xf32, #tpu.memory_space<vmem>>, %arg4: memref<32x256xf32, #tpu.memory_space<vmem>>, %arg5: memref<256x8xf32, #tpu.memory_space<vmem>>, %arg6: memref<1x8xf32, #tpu.memory_space<vmem>>, %arg7: memref<32x8xf32, #tpu.memory_space<vmem>>) attributes {dimension_semantics = [#tpu.dimension_semantics<parallel>, #tpu.dimension_semantics<parallel>], iteration_bounds = array<i64: 2, 1>, scalar_prefetch = 0 : i64, scratch_operands = 0 : i64, tpu.core_type = #tpu.core_type<tc>, window_params = [{transform_indices = @transform_0, window_bounds = array<i64: 32, 32>}, {transform_indices = @transform_1, window_bounds = array<i64: 32, 32>}, {transform_indices = @transform_2, window_bounds = array<i64: 32, 256>}, {pipeline_mode = #tpu.pipeline_mode<synchronous>, transform_indices = @transform_3, window_bounds = array<i64: 256, 8>}, {transform_indices = @transform_4, window_bounds = array<i64: 1, 8>}, {transform_indices = @transform_5, window_bounds = array<i64: 32, 8>}]} {
    %c0 = arith.constant 0 : index
    %c0_0 = arith.constant 0 : index
    %0 = vector.load %arg2[%c0, %c0_0] : memref<32x32xf32, #tpu.memory_space<vmem>>, vector<32x32xf32>
    %c0_1 = arith.constant 0 : index
    %c0_2 = arith.constant 0 : index
    %1 = vector.load %arg3[%c0_1, %c0_2] : memref<32x32xf32, #tpu.memory_space<vmem>>, vector<32x32xf32>
    %c0_3 = arith.constant 0 : index
    %c0_4 = arith.constant 0 : index
    %2 = vector.load %arg4[%c0_3, %c0_4] : memref<32x256xf32, #tpu.memory_space<vmem>>, vector<32x256xf32>
    %cst = arith.constant dense<0.000000e+00> : vector<32x256xf32>
    %3 = tpu.matmul %0, %2, %cst {dimension_numbers = #tpu.dot_dimension_numbers<[1], [0], [0], [1], [0, 0, 1, 1], [], []>} : vector<32x32xf32>, vector<32x256xf32>, vector<32x256xf32> -> vector<32x256xf32>
    %4 = tpu.concatenate %1, %1, %1, %1, %1, %1, %1, %1 in 1 : vector<32x32xf32>, vector<32x32xf32>, vector<32x32xf32>, vector<32x32xf32>, vector<32x32xf32>, vector<32x32xf32>, vector<32x32xf32>, vector<32x32xf32> -> vector<32x256xf32>
    %5 = arith.mulf %3, %4 : vector<32x256xf32>
    %c0_5 = arith.constant 0 : index
    %c0_6 = arith.constant 0 : index
    %6 = vector.load %arg5[%c0_5, %c0_6] : memref<256x8xf32, #tpu.memory_space<vmem>>, vector<256x8xf32>
    %cst_7 = arith.constant dense<0.000000e+00> : vector<32x8xf32>
    %7 = tpu.matmul %5, %6, %cst_7 {dimension_numbers = #tpu.dot_dimension_numbers<[1], [0], [0], [1], [0, 0, 1, 1], [], []>} : vector<32x256xf32>, vector<256x8xf32>, vector<32x8xf32> -> vector<32x8xf32>
    %c0_8 = arith.constant 0 : index
    %c0_9 = arith.constant 0 : index
    %8 = vector.load %arg6[%c0_8, %c0_9] : memref<1x8xf32, #tpu.memory_space<vmem>>, vector<1x8xf32>
    %9 = vector.broadcast %8 : vector<1x8xf32> to vector<32x8xf32>
    %10 = arith.addf %7, %9 : vector<32x8xf32>
    %c0_10 = arith.constant 0 : index
    %c0_11 = arith.constant 0 : index
    %11 = vector.load %arg7[%c0_10, %c0_11] : memref<32x8xf32, #tpu.memory_space<vmem>>, vector<32x8xf32>
    tpu.vector_store %arg7[%c0_10, %c0_11], %10 {strides = array<i32>} : memref<32x8xf32, #tpu.memory_space<vmem>>, vector<32x8xf32>,
    return
  }
  func.func @transform_0(%arg0: i32, %arg1: i32) -> (i32, i32) {
    %c0_i32 = arith.constant 0 : i32
    %c0_i32_0 = arith.constant 0 : i32
    return %arg0, %c0_i32 : i32, i32
  }
  func.func @transform_1(%arg0: i32, %arg1: i32) -> (i32, i32) {
    %c0_i32 = arith.constant 0 : i32
    %c0_i32_0 = arith.constant 0 : i32
    return %arg0, %c0_i32 : i32, i32
  }
  func.func @transform_2(%arg0: i32, %arg1: i32) -> (i32, i32) {
    %c0_i32 = arith.constant 0 : i32
    %c0_i32_0 = arith.constant 0 : i32
    return %c0_i32, %arg1 : i32, i32
  }
  func.func @transform_3(%arg0: i32, %arg1: i32) -> (i32, i32) {
    %c0_i32 = arith.constant 0 : i32
    %c0_i32_0 = arith.constant 0 : i32
    %c0_i32_1 = arith.constant 0 : i32
    return %c0_i32, %c0_i32_0 : i32, i32
  }
  func.func @transform_4(%arg0: i32, %arg1: i32) -> (i32, i32) {
    %c0_i32 = arith.constant 0 : i32
    %c0_i32_0 = arith.constant 0 : i32
    return %c0_i32, %arg1 : i32, i32
  }
  func.func @transform_5(%arg0: i32, %arg1: i32) -> (i32, i32) {
    %c0_i32 = arith.constant 0 : i32
    return %arg0, %arg1 : i32, i32
  }
}

</mosaic_0001>

<bundles_post_ra>
// kernel: tpu_custom_call.1
= control target key start
LH: loop header
LB: loop body
LE: loop exit
PB: predicated region body
PF: predicated region fallthrough
CT: control target
= control target key end

     0   :  { %s808_s18 = smov 0   ;;  %s810_s19 = smov 0   ;;  %s1040_s0 = inlined_call_operand.vmem [shape: f32[64,32], index: 0, kind: input, shape index: {}]   ;;  %s1041_s1 = inlined_call_operand.vmem [shape: f32[64,32], index: 1, kind: input, shape index: {}]   ;;  %s1042_s2 = inlined_call_operand.vmem [shape: f32[32,256], index: 2, kind: input, shape index: {}]   ;;  %s1043_s3 = inlined_call_operand.vmem [shape: f32[256,8], index: 3, kind: input, shape index: {}]   ;;  %s1044_s4 = inlined_call_operand.vmem [shape: f32[1,8], index: 4, kind: input, shape index: {}]   ;;  %s1045_s5 = inlined_call_operand.vmem [shape: f32[64,8], index: 5, kind: output, shape index: {}]  }
   0x1   :  { %s812_s20 = smov 0  }
   0x2 LB: > { %s27_s21 = sadd.s32 1, %s769_s19  ;;  %p674_p0 = scmp.ge.s32.totalorder %s773_s20, 1  ;;  %s773_s20 = sphi %s812_s20, %s15_s20   ;;  %s769_s19 = sphi %s810_s19, %s1047_s19   ;;  %s765_s18 = sphi %s808_s18, %s1046_s18  }
   0x3   : > { %p29_p1 = scmp.ge.s32.totalorder %s27_s21, 2  ;;  %p232_p2 = scmp.lt.s32.totalorder %s773_s20, 3 }
   0x5   : > { %s1049_s21 = smov (%p29_p1, %s27_s21), 0  ;;  %p233_p3 = pnand %p674_p0, %p232_p2 }
   0x6   : > { %s675_s28 = sshll.u32 (!%p233_p3), %s765_s18, 2  ;;  %s775_s9 = smov (!%p233_p3), 32  }
   0x7   : > { %236 = sbr.rel (%p233_p3) target bundleno = 309 (0x135), region = 40  ;;  %p277_p4 = scmp.lt.s32.totalorder (!%p233_p3), %s675_s28, 7 }
   0x8   : > { %s776_s12 = smov (!%p233_p3), 96   ;;  %s777_s15 = smov (!%p233_p3), 64  }
   0xc   : > { %v320_v0 = vld [vmem:[%s1042_s2 + $0x30] sm:$0xff]  ;;  %v321_v1 = vld [vmem:[%s1042_s2 + $0x38] sm:$0xff]  ;;  %v318_v2 = vld [vmem:[%s1042_s2 + $0x20] sm:$0xff]  ;;  %s1051_s28 = smov (!%p277_p4, %s675_s28), 7  ;;  %vm322_vm0 = vcmask 261120   ;;  %vm437_vm1 = vcmask 523264  }
   0xd   : > { %347 = vmatpush.msra.mxu0 %v320_v0  ;;  %376 = vmatpush.msra.mxu1 %v321_v1  ;;  %v319_v3 = vld [vmem:[%s1042_s2 + $0x28] sm:$0xff]  ;;  %v316_v4 = vld [vmem:[%s1042_s2 + $0x10] sm:$0xff]  ;;  %v317_v5 = vld [vmem:[%s1042_s2 + $0x18] sm:$0xff]  ;;  %s862_s25 = sshll.u32 %s1051_s28, 3  ;;  %vm442_vm2 = vcmask 785408   ;;  %vm549_vm3 = vcmask 64512  }
   0xe   : > { %v470_v6 = vld [vmem:[%s1043_s3 + $0x78] sm:$0xff]  ;;  %v469_v8 = vld [vmem:[%s1043_s3 + $0x70] sm:$0xff]  ;;  %v314_v10 = vld [vmem:[%s1042_s2] sm:$0xff]  ;;  %s868_s29 = scalar_lea.vmem %s1041_s1, %s862_s25  ;;  %s874_s7 = scalar_lea.vmem %s1040_s0, %s862_s25 }
   0xf   : > { %348 = vmatpush.msra.mxu0 %v318_v2  ;;  %377 = vmatpush.msra.mxu1 %v319_v3  ;;  %v486_v7 = vld [vmem:[%s1043_s3 + $0xf8] sm:$0xff]  ;;  %v485_v9 = vld [vmem:[%s1043_s3 + $0xf0] sm:$0xff]  ;;  %v315_v11 = vld [vmem:[%s1042_s2 + $0x8] sm:$0xff]  ;;  %s304_s28 = scalar_lea.vmem %s1045_s5, %s862_s25 }
  0x10   : > { %691 = vmatpush.msra.mxu2 %v470_v6  ;;  %707 = vmatpush.msra.mxu3 %v486_v7  ;;  %v877_v12 = vld [vmem:[%s868_s29 + $0x8] sm:$0xff]  ;;  %v306_v13 = vld [vmem:[%s874_s7] sm:$0xff]  ;;  %v893_v16 = vld [vmem:[%s868_s29 + $0x10] sm:$0xff] }
  0x11   : > { %349 = vmatpush.msra.mxu0 %v316_v4  ;;  %378 = vmatpush.msra.mxu1 %v317_v5  ;;  %v468_v14 = vld [vmem:[%s1043_s3 + $0x68] sm:$0xff]  ;;  %v467_v17 = vld [vmem:[%s1043_s3 + $0x60] sm:$0xff]  ;;  %v466_v19 = vld [vmem:[%s1043_s3 + $0x58] sm:$0xff] }
  0x12   : > { %692 = vmatpush.msra.mxu2 %v469_v8  ;;  %708 = vmatpush.msra.mxu3 %v485_v9  ;;  %v484_v15 = vld [vmem:[%s1043_s3 + $0xe8] sm:$0xff]  ;;  %v483_v18 = vld [vmem:[%s1043_s3 + $0xe0] sm:$0xff]  ;;  %v482_v20 = vld [vmem:[%s1043_s3 + $0xd8] sm:$0xff] }
  0x13   : > { %350 = vmatpush.msra.mxu0 %v314_v10  ;;  %379 = vmatpush.msra.mxu1 %v315_v11  ;;  %v307_v21 = vld [vmem:[%s874_s7 + $0x8] sm:$0xff]  ;;  %v919_v22 = vld [vmem:[%s868_s29 + $0x18] sm:$0xff]  ;;  %v308_v23 = vld [vmem:[%s874_s7 + $0x10] sm:$0xff] }
  0x14   : > { %399 = vrot.lane.b32.xlu0 %v877_v12, %s775_s9  ;;  %681 = vmatmul.msk.f32.vlgmr.msra.gmra.mxu0 %vm322_vm0, %v306_v13  ;;  %v931_v24 = vld [vmem:[%s868_s29] sm:$0xff]  ;;  %v309_v25 = vld [vmem:[%s874_s7 + $0x18] sm:$0xff]  ;;  %v465_v26 = vld [vmem:[%s1043_s3 + $0x50] sm:$0xff] }
  0x15   : > { %685 = vmatmul.msk.f32.vlgmr.msra.gmra.mxu1 %vm322_vm0, %v306_v13  ;;  %423 = vrot.lane.b32.xlu1 %v877_v12, %s776_s12  ;;  %v481_v27 = vld [vmem:[%s1043_s3 + $0xd0] sm:$0xff]  ;;  %v464_v28 = vld [vmem:[%s1043_s3 + $0x48] sm:$0xff]  ;;  %v463_v30 = vld [vmem:[%s1043_s3 + $0x40] sm:$0xff] }
  0x16   : > { %413 = vrot.lane.b32.xlu2 %v893_v16, %s777_s15  ;;  %693 = vmatpush.msra.mxu2 %v468_v14  ;;  %v480_v29 = vld [vmem:[%s1043_s3 + $0xc8] sm:$0xff]  ;;  %v479_v31 = vld [vmem:[%s1043_s3 + $0xc0] sm:$0xff]  ;;  %v462_v32 = vld [vmem:[%s1043_s3 + $0x38] sm:$0xff] }
  0x17   : > { %709 = vmatpush.msra.mxu3 %v484_v15  ;;  %491 = vmatpush.msrb.mxu0 %v470_v6  ;;  %v478_v33 = vld [vmem:[%s1043_s3 + $0xb8] sm:$0xff]  ;;  %v461_v34 = vld [vmem:[%s1043_s3 + $0x30] sm:$0xff]  ;;  %v460_v36 = vld [vmem:[%s1043_s3 + $0x28] sm:$0xff] }
  0x18   : > { %694 = vmatpush.msra.mxu2 %v467_v17  ;;  %520 = vmatpush.msrb.mxu1 %v486_v7  ;;  %v477_v35 = vld [vmem:[%s1043_s3 + $0xb0] sm:$0xff]  ;;  %v476_v37 = vld [vmem:[%s1043_s3 + $0xa8] sm:$0xff]  ;;  %v459_v38 = vld [vmem:[%s1043_s3 + $0x20] sm:$0xff] }
  0x19   : > { %710 = vmatpush.msra.mxu3 %v483_v18  ;;  %492 = vmatpush.msrb.mxu0 %v469_v8  ;;  %v475_v39 = vld [vmem:[%s1043_s3 + $0xa0] sm:$0xff]  ;;  %v458_v40 = vld [vmem:[%s1043_s3 + $0x18] sm:$0xff]  ;;  %v457_v42 = vld [vmem:[%s1043_s3 + $0x10] sm:$0xff] }
  0x1a   : > { %695 = vmatpush.msra.mxu2 %v466_v19  ;;  %521 = vmatpush.msrb.mxu1 %v485_v9  ;;  %v474_v41 = vld [vmem:[%s1043_s3 + $0x98] sm:$0xff]  ;;  %v473_v43 = vld [vmem:[%s1043_s3 + $0x90] sm:$0xff]  ;;  %v456_v44 = vld [vmem:[%s1043_s3 + $0x8] sm:$0xff] }
  0x1b   : > { %711 = vmatpush.msra.mxu3 %v482_v20  ;;  %493 = vmatpush.msrb.mxu0 %v468_v14  ;;  %v472_v45 = vld [vmem:[%s1043_s3 + $0x88] sm:$0xff]  ;;  %v455_v46 = vld [vmem:[%s1043_s3] sm:$0xff] }
  0x1c   : > { %411 = vrot.lane.b32.xlu0 %v877_v12, %s777_s15  ;;  %682 = vmatmul.msk.f32.gmra.mxu0 %vm322_vm0, %v307_v21  ;;  %v471_v47 = vld [vmem:[%s1043_s3 + $0x80] sm:$0xff] }
  0x1d   : > { %686 = vmatmul.msk.f32.gmra.mxu1 %vm322_vm0, %v307_v21  ;;  %401 = vrot.lane.b32.xlu1 %v893_v16, %s775_s9 }
  0x1e   : > { %425 = vrot.lane.b32.xlu2 %v893_v16, %s776_s12  ;;  %522 = vmatpush.msrb.mxu1 %v484_v15 }
  0x1f   : > { %494 = vmatpush.msrb.mxu0 %v467_v17  ;;  %696 = vmatpush.msra.mxu2 %v465_v26 }
  0x20   : > { %523 = vmatpush.msrb.mxu1 %v483_v18  ;;  %712 = vmatpush.msra.mxu3 %v481_v27 }
  0x21   : > { %495 = vmatpush.msrb.mxu0 %v466_v19  ;;  %697 = vmatpush.msra.mxu2 %v464_v28 }
  0x22   : > { %524 = vmatpush.msrb.mxu1 %v482_v20  ;;  %713 = vmatpush.msra.mxu3 %v480_v29 }
  0x23   : > { %496 = vmatpush.msrb.mxu0 %v465_v26  ;;  %698 = vmatpush.msra.mxu2 %v463_v30 }
  0x24   : > { %403 = vrot.lane.b32.xlu0 %v919_v22, %s775_s9  ;;  %683 = vmatmul.msk.f32.gmra.mxu0 %vm322_vm0, %v308_v23 }
  0x25   : > { %687 = vmatmul.msk.f32.gmra.mxu1 %vm322_vm0, %v308_v23  ;;  %415 = vrot.lane.b32.xlu1 %v919_v22, %s777_s15 }
  0x26   : > { %427 = vrot.lane.b32.xlu2 %v919_v22, %s776_s12  ;;  %525 = vmatpush.msrb.mxu1 %v481_v27 }
  0x27   : > { %497 = vmatpush.msrb.mxu0 %v464_v28  ;;  %714 = vmatpush.msra.mxu3 %v479_v31 }
  0x28   : > { %526 = vmatpush.msrb.mxu1 %v480_v29  ;;  %699 = vmatpush.msra.mxu2 %v462_v32 }
  0x29   : > { %498 = vmatpush.msrb.mxu0 %v463_v30  ;;  %715 = vmatpush.msra.mxu3 %v478_v33 }
  0x2a   : > { %527 = vmatpush.msrb.mxu1 %v479_v31  ;;  %700 = vmatpush.msra.mxu2 %v461_v34 }
  0x2b   : > { %499 = vmatpush.msrb.mxu0 %v462_v32  ;;  %716 = vmatpush.msra.mxu3 %v477_v35 }
  0x2c   : > { %397 = vrot.lane.b32.xlu0 %v931_v24, %s775_s9  ;;  %684 = vmatmul.msk.f32.gmra.mxu0 %vm322_vm0, %v309_v25 }
  0x2d   : > { %688 = vmatmul.msk.f32.gmra.mxu1 %vm322_vm0, %v309_v25  ;;  %409 = vrot.lane.b32.xlu1 %v931_v24, %s777_s15 }
  0x2e   : > { %421 = vrot.lane.b32.xlu2 %v931_v24, %s776_s12  ;;  %528 = vmatpush.msrb.mxu1 %v478_v33 }
  0x2f   : > { %500 = vmatpush.msrb.mxu0 %v461_v34  ;;  %701 = vmatpush.msra.mxu2 %v460_v36 }
  0x30   : > { %529 = vmatpush.msrb.mxu1 %v477_v35  ;;  %717 = vmatpush.msra.mxu3 %v476_v37 }
  0x31   : > { %501 = vmatpush.msrb.mxu0 %v460_v36  ;;  %702 = vmatpush.msra.mxu2 %v459_v38 }
  0x32   : > { %530 = vmatpush.msrb.mxu1 %v476_v37  ;;  %718 = vmatpush.msra.mxu3 %v475_v39 }
  0x33   : > { %502 = vmatpush.msrb.mxu0 %v459_v38  ;;  %703 = vmatpush.msra.mxu2 %v458_v40 }
  0x34   : > { %531 = vmatpush.msrb.mxu1 %v475_v39  ;;  %719 = vmatpush.msra.mxu3 %v474_v41 }
  0x35   : > { %503 = vmatpush.msrb.mxu0 %v458_v40  ;;  %704 = vmatpush.msra.mxu2 %v457_v42 }
  0x36   : > { %532 = vmatpush.msrb.mxu1 %v474_v41  ;;  %720 = vmatpush.msra.mxu3 %v473_v43 }
  0x37   : > { %504 = vmatpush.msrb.mxu0 %v457_v42  ;;  %705 = vmatpush.msra.mxu2 %v456_v44 }
  0x38   : > { %533 = vmatpush.msrb.mxu1 %v473_v43  ;;  %721 = vmatpush.msra.mxu3 %v472_v45 }
  0x39   : > { %505 = vmatpush.msrb.mxu0 %v456_v44  ;;  %706 = vmatpush.msra.mxu2 %v455_v46 }
  0x3a   : > { %534 = vmatpush.msrb.mxu1 %v472_v45  ;;  %722 = vmatpush.msra.mxu3 %v471_v47 }
  0x3b   : > { %506 = vmatpush.msrb.mxu0 %v455_v46 }
  0x3c   : > { %535 = vmatpush.msrb.mxu1 %v471_v47 }
  0x70   : > { %v414_v48 = vpop.permute.xlu2 %413 }
  0x78   : > { %v426_v51 = vpop.permute.xlu2 %425 }
  0x80   : > { %v428_v57 = vpop.permute.xlu2 %427 }
  0x86   : > { %v400_v49 = vpop.permute.xlu0 %399 }
  0x87   : > { %v424_v50 = vpop.permute.xlu1 %423  ;;  %v434_v56 = vsel %vm322_vm0, %v877_v12, %v400_v49 }
  0x88   : > { %v422_v4 = vpop.permute.xlu2 %421 }
  0x8e   : > { %v412_v52 = vpop.permute.xlu0 %411 }
  0x8f   : > { %v402_v53 = vpop.permute.xlu1 %401  ;;  %v439_v58 = vsel %vm437_vm1, %v434_v56, %v412_v52 }
  0x90   : > { %v444_v62 = vsel %vm442_vm2, %v439_v58, %v424_v50  ;;  %v435_v1 = vsel %vm322_vm0, %v893_v16, %v402_v53 }
  0x91   : > { %v352_v54 = vpop.f32.mrf.mxu0  ;;  %v440_v5 = vsel %vm437_vm1, %v435_v1, %v414_v48 }
  0x92   : > { %v381_v55 = vpop.f32.mrf.mxu1  ;;  %v445_v11 = vsel %vm442_vm2, %v440_v5, %v426_v51 }
  0x96   : > { %v404_v59 = vpop.permute.xlu0 %403 }
  0x97   : > { %v416_v60 = vpop.permute.xlu1 %415  ;;  %v436_v16 = vsel %vm322_vm0, %v919_v22, %v404_v59  ;;  %v750_v22 = vld [vmem:[%s1044_s4] ss:$0 sm:$0xff] }
  0x98   : > { %v441_v18 = vsel %vm437_vm1, %v436_v16, %v416_v60 }
  0x99   : > { %v355_v61 = vpop.f32.mrf.mxu0  ;;  %v446_v20 = vsel %vm442_vm2, %v441_v18, %v428_v57 }
  0x9a   : > { %v449_v63 = vmul.f32 %v444_v62, %v355_v61  ;;  %v384_v0 = vpop.f32.mrf.mxu1 }
  0x9b   : > { %v450_v2 = vmul.f32 %v444_v62, %v384_v0 }
  0x9c   : > { %510 = vmatmul.f32.vlgmr.msra.gmra.mxu2 %v449_v63 }
  0x9d   : > { %539 = vmatmul.f32.vlgmr.msra.gmra.mxu3 %v450_v2 }
  0x9e   : > { %v398_v3 = vpop.permute.xlu0 %397 }
  0x9f   : > { %v433_v6 = vsel %vm322_vm0, %v931_v24, %v398_v3  ;;  %v410_v7 = vpop.permute.xlu1 %409 }
  0xa0   : > { %v438_v8 = vsel %vm437_vm1, %v433_v6, %v410_v7 }
  0xa1   : > { %v443_v9 = vsel %vm442_vm2, %v438_v8, %v422_v4  ;;  %v358_v10 = vpop.f32.mrf.mxu0 }
  0xa2   : > { %v447_v12 = vmul.f32 %v443_v9, %v352_v54  ;;  %v448_v13 = vmul.f32 %v443_v9, %v381_v55  ;;  %v451_v14 = vmul.f32 %v445_v11, %v358_v10  ;;  %v387_v15 = vpop.f32.mrf.mxu1 }
  0xa3   : > { %v452_v17 = vmul.f32 %v445_v11, %v387_v15 }
  0xa4   : > { %507 = vmatmul.f32.vlgmr.msrb.gmra.mxu0 %v447_v12  ;;  %513 = vmatmul.f32.gmra.mxu2 %v451_v14 }
  0xa5   : > { %536 = vmatmul.f32.vlgmr.msrb.gmra.mxu1 %v448_v13  ;;  %542 = vmatmul.f32.gmra.mxu3 %v452_v17 }
  0xa9   : > { %v361_v19 = vpop.f32.mrf.mxu0 }
  0xaa   : > { %v453_v21 = vmul.f32 %v446_v20, %v361_v19  ;;  %v390_v23 = vpop.f32.mrf.mxu1 }
  0xab   : > { %v454_v24 = vmul.f32 %v446_v20, %v390_v23 }
  0xac   : > { %516 = vmatmul.f32.gmra.mxu2 %v453_v21 }
  0xad   : > { %545 = vmatmul.f32.gmra.mxu3 %v454_v24 }
 0x11f   : > { %v511_v25 = vpop.f32.mrf.mxu2 }
 0x120   : > { %v540_v26 = vpop.f32.mrf.mxu3  ;;  %v512_v27 = vadd.f32 %v750_v22, %v511_v25 }
 0x121   : > { %v508_v28 = vpop.f32.mrf.mxu0 }
 0x122   : > { %v509_v29 = vadd.f32 %v750_v22, %v508_v28  ;;  %v537_v30 = vpop.f32.mrf.mxu1  ;;  %v541_v32 = vadd.f32 %v540_v26, %v512_v27 }
 0x124   : > { %v538_v31 = vadd.f32 %v537_v30, %v509_v29  ;;  %551 = vst.msk [vmem:[%s304_s28 + $0x8] sm:$0xff] %vm549_vm3, %v541_v32 }
 0x126   : > { %550 = vst.msk [vmem:[%s304_s28] sm:$0xff] %vm549_vm3, %v538_v31 }
 0x127   : > { %v514_v33 = vpop.f32.mrf.mxu2 }
 0x128   : > { %v515_v34 = vadd.f32 %v750_v22, %v514_v33  ;;  %v543_v35 = vpop.f32.mrf.mxu3 }
 0x12a   : > { %v544_v36 = vadd.f32 %v543_v35, %v515_v34 }
 0x12c   : > { %552 = vst.msk [vmem:[%s304_s28 + $0x10] sm:$0xff] %vm549_vm3, %v544_v36 }
 0x12f   : > { %v517_v37 = vpop.f32.mrf.mxu2 }
 0x130   : > { %v518_v38 = vadd.f32 %v750_v22, %v517_v37  ;;  %v546_v39 = vpop.f32.mrf.mxu3 }
 0x132   : > { %v547_v40 = vadd.f32 %v546_v39, %v518_v38 }
 0x134   : > { %553 = vst.msk [vmem:[%s304_s28 + $0x18] sm:$0xff] %vm549_vm3, %v547_v40 }
 0x135 PF: > { %s15_s20 = sadd.s32 1, %s773_s20   ;;  %s1046_s18 = smov %s769_s19 }
 0x136   : > { %p12_p5 = scmp.ge.s32.totalorder %s15_s20, 4   ;;  %s1047_s19 = smov %s1049_s21 }
 0x138   :  { %14 = sbr.rel (!%p12_p5) target bundleno = 2 (0x2), region = 79 }

// kernel: tpu_custom_call.1
= control target key start
LH: loop header
LB: loop body
LE: loop exit
PB: predicated region body
PF: predicated region fallthrough
CT: control target
= control target key end

     0   :  { %s808_s18 = smov 0   ;;  %s810_s19 = smov 0   ;;  %s1040_s0 = inlined_call_operand.vmem [shape: f32[64,32], index: 0, kind: input, shape index: {}]   ;;  %s1041_s1 = inlined_call_operand.vmem [shape: f32[64,32], index: 1, kind: input, shape index: {}]   ;;  %s1042_s2 = inlined_call_operand.vmem [shape: f32[32,256], index: 2, kind: input, shape index: {}]   ;;  %s1043_s3 = inlined_call_operand.vmem [shape: f32[256,8], index: 3, kind: input, shape index: {}]   ;;  %s1044_s4 = inlined_call_operand.vmem [shape: f32[1,8], index: 4, kind: input, shape index: {}]   ;;  %s1045_s5 = inlined_call_operand.vmem [shape: f32[64,8], index: 5, kind: output, shape index: {}]  }
   0x1   :  { %s812_s20 = smov 0  }
   0x2 LB: > { %s27_s21 = sadd.s32 1, %s769_s19  ;;  %p674_p0 = scmp.ge.s32.totalorder %s773_s20, 1  ;;  %s773_s20 = sphi %s812_s20, %s15_s20   ;;  %s769_s19 = sphi %s810_s19, %s1047_s19   ;;  %s765_s18 = sphi %s808_s18, %s1046_s18  }
   0x3   : > { %p29_p1 = scmp.ge.s32.totalorder %s27_s21, 2  ;;  %p232_p2 = scmp.lt.s32.totalorder %s773_s20, 3 }
   0x5   : > { %s1049_s21 = smov (%p29_p1, %s27_s21), 0  ;;  %p233_p3 = pnand %p674_p0, %p232_p2 }
   0x6   : > { %s675_s28 = sshll.u32 (!%p233_p3), %s765_s18, 2  ;;  %s775_s9 = smov (!%p233_p3), 32  }
   0x7   : > { %236 = sbr.rel (%p233_p3) target bundleno = 309 (0x135), region = 40  ;;  %p277_p4 = scmp.lt.s32.totalorder (!%p233_p3), %s675_s28, 7 }
   0x8   : > { %s776_s12 = smov (!%p233_p3), 96   ;;  %s777_s15 = smov (!%p233_p3), 64  }
   0xc   : > { %v320_v0 = vld [vmem:[%s1042_s2 + $0x30] sm:$0xff]  ;;  %v321_v1 = vld [vmem:[%s1042_s2 + $0x38] sm:$0xff]  ;;  %v318_v2 = vld [vmem:[%s1042_s2 + $0x20] sm:$0xff]  ;;  %s1051_s28 = smov (!%p277_p4, %s675_s28), 7  ;;  %vm322_vm0 = vcmask 261120   ;;  %vm437_vm1 = vcmask 523264  }
   0xd   : > { %347 = vmatpush.msra.mxu0 %v320_v0  ;;  %376 = vmatpush.msra.mxu1 %v321_v1  ;;  %v319_v3 = vld [vmem:[%s1042_s2 + $0x28] sm:$0xff]  ;;  %v316_v4 = vld [vmem:[%s1042_s2 + $0x10] sm:$0xff]  ;;  %v317_v5 = vld [vmem:[%s1042_s2 + $0x18] sm:$0xff]  ;;  %s862_s25 = sshll.u32 %s1051_s28, 3  ;;  %vm442_vm2 = vcmask 785408   ;;  %vm549_vm3 = vcmask 64512  }
   0xe   : > { %v470_v6 = vld [vmem:[%s1043_s3 + $0x78] sm:$0xff]  ;;  %v469_v8 = vld [vmem:[%s1043_s3 + $0x70] sm:$0xff]  ;;  %v314_v10 = vld [vmem:[%s1042_s2] sm:$0xff]  ;;  %s868_s29 = scalar_lea.vmem %s1041_s1, %s862_s25  ;;  %s874_s7 = scalar_lea.vmem %s1040_s0, %s862_s25 }
   0xf   : > { %348 = vmatpush.msra.mxu0 %v318_v2  ;;  %377 = vmatpush.msra.mxu1 %v319_v3  ;;  %v486_v7 = vld [vmem:[%s1043_s3 + $0xf8] sm:$0xff]  ;;  %v485_v9 = vld [vmem:[%s1043_s3 + $0xf0] sm:$0xff]  ;;  %v315_v11 = vld [vmem:[%s1042_s2 + $0x8] sm:$0xff]  ;;  %s304_s28 = scalar_lea.vmem %s1045_s5, %s862_s25 }
  0x10   : > { %691 = vmatpush.msra.mxu2 %v470_v6  ;;  %707 = vmatpush.msra.mxu3 %v486_v7  ;;  %v877_v12 = vld [vmem:[%s868_s29 + $0x8] sm:$0xff]  ;;  %v306_v13 = vld [vmem:[%s874_s7] sm:$0xff]  ;;  %v893_v16 = vld [vmem:[%s868_s29 + $0x10] sm:$0xff] }
  0x11   : > { %349 = vmatpush.msra.mxu0 %v316_v4  ;;  %378 = vmatpush.msra.mxu1 %v317_v5  ;;  %v468_v14 = vld [vmem:[%s1043_s3 + $0x68] sm:$0xff]  ;;  %v467_v17 = vld [vmem:[%s1043_s3 + $0x60] sm:$0xff]  ;;  %v466_v19 = vld [vmem:[%s1043_s3 + $0x58] sm:$0xff] }
  0x12   : > { %692 = vmatpush.msra.mxu2 %v469_v8  ;;  %708 = vmatpush.msra.mxu3 %v485_v9  ;;  %v484_v15 = vld [vmem:[%s1043_s3 + $0xe8] sm:$0xff]  ;;  %v483_v18 = vld [vmem:[%s1043_s3 + $0xe0] sm:$0xff]  ;;  %v482_v20 = vld [vmem:[%s1043_s3 + $0xd8] sm:$0xff] }
  0x13   : > { %350 = vmatpush.msra.mxu0 %v314_v10  ;;  %379 = vmatpush.msra.mxu1 %v315_v11  ;;  %v307_v21 = vld [vmem:[%s874_s7 + $0x8] sm:$0xff]  ;;  %v919_v22 = vld [vmem:[%s868_s29 + $0x18] sm:$0xff]  ;;  %v308_v23 = vld [vmem:[%s874_s7 + $0x10] sm:$0xff] }
  0x14   : > { %399 = vrot.lane.b32.xlu0 %v877_v12, %s775_s9  ;;  %681 = vmatmul.msk.f32.vlgmr.msra.gmra.mxu0 %vm322_vm0, %v306_v13  ;;  %v931_v24 = vld [vmem:[%s868_s29] sm:$0xff]  ;;  %v309_v25 = vld [vmem:[%s874_s7 + $0x18] sm:$0xff]  ;;  %v465_v26 = vld [vmem:[%s1043_s3 + $0x50] sm:$0xff] }
  0x15   : > { %685 = vmatmul.msk.f32.vlgmr.msra.gmra.mxu1 %vm322_vm0, %v306_v13  ;;  %423 = vrot.lane.b32.xlu1 %v877_v12, %s776_s12  ;;  %v481_v27 = vld [vmem:[%s1043_s3 + $0xd0] sm:$0xff]  ;;  %v464_v28 = vld [vmem:[%s1043_s3 + $0x48] sm:$0xff]  ;;  %v463_v30 = vld [vmem:[%s1043_s3 + $0x40] sm:$0xff] }
  0x16   : > { %413 = vrot.lane.b32.xlu2 %v893_v16, %s777_s15  ;;  %693 = vmatpush.msra.mxu2 %v468_v14  ;;  %v480_v29 = vld [vmem:[%s1043_s3 + $0xc8] sm:$0xff]  ;;  %v479_v31 = vld [vmem:[%s1043_s3 + $0xc0] sm:$0xff]  ;;  %v462_v32 = vld [vmem:[%s1043_s3 + $0x38] sm:$0xff] }
  0x17   : > { %709 = vmatpush.msra.mxu3 %v484_v15  ;;  %491 = vmatpush.msrb.mxu0 %v470_v6  ;;  %v478_v33 = vld [vmem:[%s1043_s3 + $0xb8] sm:$0xff]  ;;  %v461_v34 = vld [vmem:[%s1043_s3 + $0x30] sm:$0xff]  ;;  %v460_v36 = vld [vmem:[%s1043_s3 + $0x28] sm:$0xff] }
  0x18   : > { %694 = vmatpush.msra.mxu2 %v467_v17  ;;  %520 = vmatpush.msrb.mxu1 %v486_v7  ;;  %v477_v35 = vld [vmem:[%s1043_s3 + $0xb0] sm:$0xff]  ;;  %v476_v37 = vld [vmem:[%s1043_s3 + $0xa8] sm:$0xff]  ;;  %v459_v38 = vld [vmem:[%s1043_s3 + $0x20] sm:$0xff] }
  0x19   : > { %710 = vmatpush.msra.mxu3 %v483_v18  ;;  %492 = vmatpush.msrb.mxu0 %v469_v8  ;;  %v475_v39 = vld [vmem:[%s1043_s3 + $0xa0] sm:$0xff]  ;;  %v458_v40 = vld [vmem:[%s1043_s3 + $0x18] sm:$0xff]  ;;  %v457_v42 = vld [vmem:[%s1043_s3 + $0x10] sm:$0xff] }
  0x1a   : > { %695 = vmatpush.msra.mxu2 %v466_v19  ;;  %521 = vmatpush.msrb.mxu1 %v485_v9  ;;  %v474_v41 = vld [vmem:[%s1043_s3 + $0x98] sm:$0xff]  ;;  %v473_v43 = vld [vmem:[%s1043_s3 + $0x90] sm:$0xff]  ;;  %v456_v44 = vld [vmem:[%s1043_s3 + $0x8] sm:$0xff] }
  0x1b   : > { %711 = vmatpush.msra.mxu3 %v482_v20  ;;  %493 = vmatpush.msrb.mxu0 %v468_v14  ;;  %v472_v45 = vld [vmem:[%s1043_s3 + $0x88] sm:$0xff]  ;;  %v455_v46 = vld [vmem:[%s1043_s3] sm:$0xff] }
  0x1c   : > { %411 = vrot.lane.b32.xlu0 %v877_v12, %s777_s15  ;;  %682 = vmatmul.msk.f32.gmra.mxu0 %vm322_vm0, %v307_v21  ;;  %v471_v47 = vld [vmem:[%s1043_s3 + $0x80] sm:$0xff] }
  0x1d   : > { %686 = vmatmul.msk.f32.gmra.mxu1 %vm322_vm0, %v307_v21  ;;  %401 = vrot.lane.b32.xlu1 %v893_v16, %s775_s9 }
  0x1e   : > { %425 = vrot.lane.b32.xlu2 %v893_v16, %s776_s12  ;;  %522 = vmatpush.msrb.mxu1 %v484_v15 }
  0x1f   : > { %494 = vmatpush.msrb.mxu0 %v467_v17  ;;  %696 = vmatpush.msra.mxu2 %v465_v26 }
  0x20   : > { %523 = vmatpush.msrb.mxu1 %v483_v18  ;;  %712 = vmatpush.msra.mxu3 %v481_v27 }
  0x21   : > { %495 = vmatpush.msrb.mxu0 %v466_v19  ;;  %697 = vmatpush.msra.mxu2 %v464_v28 }
  0x22   : > { %524 = vmatpush.msrb.mxu1 %v482_v20  ;;  %713 = vmatpush.msra.mxu3 %v480_v29 }
  0x23   : > { %496 = vmatpush.msrb.mxu0 %v465_v26  ;;  %698 = vmatpush.msra.mxu2 %v463_v30 }
  0x24   : > { %403 = vrot.lane.b32.xlu0 %v919_v22, %s775_s9  ;;  %683 = vmatmul.msk.f32.gmra.mxu0 %vm322_vm0, %v308_v23 }
  0x25   : > { %687 = vmatmul.msk.f32.gmra.mxu1 %vm322_vm0, %v308_v23  ;;  %415 = vrot.lane.b32.xlu1 %v919_v22, %s777_s15 }
  0x26   : > { %427 = vrot.lane.b32.xlu2 %v919_v22, %s776_s12  ;;  %525 = vmatpush.msrb.mxu1 %v481_v27 }
  0x27   : > { %497 = vmatpush.msrb.mxu0 %v464_v28  ;;  %714 = vmatpush.msra.mxu3 %v479_v31 }
  0x28   : > { %526 = vmatpush.msrb.mxu1 %v480_v29  ;;  %699 = vmatpush.msra.mxu2 %v462_v32 }
  0x29   : > { %498 = vmatpush.msrb.mxu0 %v463_v30  ;;  %715 = vmatpush.msra.mxu3 %v478_v33 }
  0x2a   : > { %527 = vmatpush.msrb.mxu1 %v479_v31  ;;  %700 = vmatpush.msra.mxu2 %v461_v34 }
  0x2b   : > { %499 = vmatpush.msrb.mxu0 %v462_v32  ;;  %716 = vmatpush.msra.mxu3 %v477_v35 }
  0x2c   : > { %397 = vrot.lane.b32.xlu0 %v931_v24, %s775_s9  ;;  %684 = vmatmul.msk.f32.gmra.mxu0 %vm322_vm0, %v309_v25 }
  0x2d   : > { %688 = vmatmul.msk.f32.gmra.mxu1 %vm322_vm0, %v309_v25  ;;  %409 = vrot.lane.b32.xlu1 %v931_v24, %s777_s15 }
  0x2e   : > { %421 = vrot.lane.b32.xlu2 %v931_v24, %s776_s12  ;;  %528 = vmatpush.msrb.mxu1 %v478_v33 }
  0x2f   : > { %500 = vmatpush.msrb.mxu0 %v461_v34  ;;  %701 = vmatpush.msra.mxu2 %v460_v36 }
  0x30   : > { %529 = vmatpush.msrb.mxu1 %v477_v35  ;;  %717 = vmatpush.msra.mxu3 %v476_v37 }
  0x31   : > { %501 = vmatpush.msrb.mxu0 %v460_v36  ;;  %702 = vmatpush.msra.mxu2 %v459_v38 }
  0x32   : > { %530 = vmatpush.msrb.mxu1 %v476_v37  ;;  %718 = vmatpush.msra.mxu3 %v475_v39 }
  0x33   : > { %502 = vmatpush.msrb.mxu0 %v459_v38  ;;  %703 = vmatpush.msra.mxu2 %v458_v40 }
  0x34   : > { %531 = vmatpush.msrb.mxu1 %v475_v39  ;;  %719 = vmatpush.msra.mxu3 %v474_v41 }
  0x35   : > { %503 = vmatpush.msrb.mxu0 %v458_v40  ;;  %704 = vmatpush.msra.mxu2 %v457_v42 }
  0x36   : > { %532 = vmatpush.msrb.mxu1 %v474_v41  ;;  %720 = vmatpush.msra.mxu3 %v473_v43 }
  0x37   : > { %504 = vmatpush.msrb.mxu0 %v457_v42  ;;  %705 = vmatpush.msra.mxu2 %v456_v44 }
  0x38   : > { %533 = vmatpush.msrb.mxu1 %v473_v43  ;;  %721 = vmatpush.msra.mxu3 %v472_v45 }
  0x39   : > { %505 = vmatpush.msrb.mxu0 %v456_v44  ;;  %706 = vmatpush.msra.mxu2 %v455_v46 }
  0x3a   : > { %534 = vmatpush.msrb.mxu1 %v472_v45  ;;  %722 = vmatpush.msra.mxu3 %v471_v47 }
  0x3b   : > { %506 = vmatpush.msrb.mxu0 %v455_v46 }
  0x3c   : > { %535 = vmatpush.msrb.mxu1 %v471_v47 }
  0x70   : > { %v414_v48 = vpop.permute.xlu2 %413 }
  0x78   : > { %v426_v51 = vpop.permute.xlu2 %425 }
  0x80   : > { %v428_v57 = vpop.permute.xlu2 %427 }
  0x86   : > { %v400_v49 = vpop.permute.xlu0 %399 }
  0x87   : > { %v424_v50 = vpop.permute.xlu1 %423  ;;  %v434_v56 = vsel %vm322_vm0, %v877_v12, %v400_v49 }
  0x88   : > { %v422_v4 = vpop.permute.xlu2 %421 }
  0x8e   : > { %v412_v52 = vpop.permute.xlu0 %411 }
  0x8f   : > { %v402_v53 = vpop.permute.xlu1 %401  ;;  %v439_v58 = vsel %vm437_vm1, %v434_v56, %v412_v52 }
  0x90   : > { %v444_v62 = vsel %vm442_vm2, %v439_v58, %v424_v50  ;;  %v435_v1 = vsel %vm322_vm0, %v893_v16, %v402_v53 }
  0x91   : > { %v352_v54 = vpop.f32.mrf.mxu0  ;;  %v440_v5 = vsel %vm437_vm1, %v435_v1, %v414_v48 }
  0x92   : > { %v381_v55 = vpop.f32.mrf.mxu1  ;;  %v445_v11 = vsel %vm442_vm2, %v440_v5, %v426_v51 }
  0x96   : > { %v404_v59 = vpop.permute.xlu0 %403 }
  0x97   : > { %v416_v60 = vpop.permute.xlu1 %415  ;;  %v436_v16 = vsel %vm322_vm0, %v919_v22, %v404_v59  ;;  %v750_v22 = vld [vmem:[%s1044_s4] ss:$0 sm:$0xff] }
  0x98   : > { %v441_v18 = vsel %vm437_vm1, %v436_v16, %v416_v60 }
  0x99   : > { %v355_v61 = vpop.f32.mrf.mxu0  ;;  %v446_v20 = vsel %vm442_vm2, %v441_v18, %v428_v57 }
  0x9a   : > { %v449_v63 = vmul.f32 %v444_v62, %v355_v61  ;;  %v384_v0 = vpop.f32.mrf.mxu1 }
  0x9b   : > { %v450_v2 = vmul.f32 %v444_v62, %v384_v0 }
  0x9c   : > { %510 = vmatmul.f32.vlgmr.msra.gmra.mxu2 %v449_v63 }
  0x9d   : > { %539 = vmatmul.f32.vlgmr.msra.gmra.mxu3 %v450_v2 }
  0x9e   : > { %v398_v3 = vpop.permute.xlu0 %397 }
  0x9f   : > { %v433_v6 = vsel %vm322_vm0, %v931_v24, %v398_v3  ;;  %v410_v7 = vpop.permute.xlu1 %409 }
  0xa0   : > { %v438_v8 = vsel %vm437_vm1, %v433_v6, %v410_v7 }
  0xa1   : > { %v443_v9 = vsel %vm442_vm2, %v438_v8, %v422_v4  ;;  %v358_v10 = vpop.f32.mrf.mxu0 }
  0xa2   : > { %v447_v12 = vmul.f32 %v443_v9, %v352_v54  ;;  %v448_v13 = vmul.f32 %v443_v9, %v381_v55  ;;  %v451_v14 = vmul.f32 %v445_v11, %v358_v10  ;;  %v387_v15 = vpop.f32.mrf.mxu1 }
  0xa3   : > { %v452_v17 = vmul.f32 %v445_v11, %v387_v15 }
  0xa4   : > { %507 = vmatmul.f32.vlgmr.msrb.gmra.mxu0 %v447_v12  ;;  %513 = vmatmul.f32.gmra.mxu2 %v451_v14 }
  0xa5   : > { %536 = vmatmul.f32.vlgmr.msrb.gmra.mxu1 %v448_v13  ;;  %542 = vmatmul.f32.gmra.mxu3 %v452_v17 }
  0xa9   : > { %v361_v19 = vpop.f32.mrf.mxu0 }
  0xaa   : > { %v453_v21 = vmul.f32 %v446_v20, %v361_v19  ;;  %v390_v23 = vpop.f32.mrf.mxu1 }
  0xab   : > { %v454_v24 = vmul.f32 %v446_v20, %v390_v23 }
  0xac   : > { %516 = vmatmul.f32.gmra.mxu2 %v453_v21 }
  0xad   : > { %545 = vmatmul.f32.gmra.mxu3 %v454_v24 }
 0x11f   : > { %v511_v25 = vpop.f32.mrf.mxu2 }
 0x120   : > { %v540_v26 = vpop.f32.mrf.mxu3  ;;  %v512_v27 = vadd.f32 %v750_v22, %v511_v25 }
 0x121   : > { %v508_v28 = vpop.f32.mrf.mxu0 }
 0x122   : > { %v509_v29 = vadd.f32 %v750_v22, %v508_v28  ;;  %v537_v30 = vpop.f32.mrf.mxu1  ;;  %v541_v32 = vadd.f32 %v540_v26, %v512_v27 }
 0x124   : > { %v538_v31 = vadd.f32 %v537_v30, %v509_v29  ;;  %551 = vst.msk [vmem:[%s304_s28 + $0x8] sm:$0xff] %vm549_vm3, %v541_v32 }
 0x126   : > { %550 = vst.msk [vmem:[%s304_s28] sm:$0xff] %vm549_vm3, %v538_v31 }
 0x127   : > { %v514_v33 = vpop.f32.mrf.mxu2 }
 0x128   : > { %v515_v34 = vadd.f32 %v750_v22, %v514_v33  ;;  %v543_v35 = vpop.f32.mrf.mxu3 }
 0x12a   : > { %v544_v36 = vadd.f32 %v543_v35, %v515_v34 }
 0x12c   : > { %552 = vst.msk [vmem:[%s304_s28 + $0x10] sm:$0xff] %vm549_vm3, %v544_v36 }
 0x12f   : > { %v517_v37 = vpop.f32.mrf.mxu2 }
 0x130   : > { %v518_v38 = vadd.f32 %v750_v22, %v517_v37  ;;  %v546_v39 = vpop.f32.mrf.mxu3 }
 0x132   : > { %v547_v40 = vadd.f32 %v546_v39, %v518_v38 }
 0x134   : > { %553 = vst.msk [vmem:[%s304_s28 + $0x18] sm:$0xff] %vm549_vm3, %v547_v40 }
 0x135 PF: > { %s15_s20 = sadd.s32 1, %s773_s20   ;;  %s1046_s18 = smov %s769_s19 }
 0x136   : > { %p12_p5 = scmp.ge.s32.totalorder %s15_s20, 4   ;;  %s1047_s19 = smov %s1049_s21 }
 0x138   :  { %14 = sbr.rel (!%p12_p5) target bundleno = 2 (0x2), region = 79 }

</bundles_post_ra>
